<compile_context>
chip_gen: v7x
topology: tpu7x:2x2x1
jax: 0.10.0
libtpu: 0.0.40
codegen_flags: <defaults>
</compile_context>

<pallas_src>
import functools

import jax
import jax.numpy as jnp
from jax.experimental import pallas as pl
from jax.experimental.pallas import tpu as pltpu

# ---- Hopper-v3 default environment parameters (gym mujoco defaults) ----------
FORWARD_REWARD_WEIGHT = 1.0
CTRL_COST_WEIGHT = 1e-3
HEALTHY_REWARD = 1.0
TERMINATE_WHEN_UNHEALTHY = True              # default -> no is_healthy masking
HEALTHY_STATE_RANGE = (-100.0, 100.0)
HEALTHY_Z_RANGE = (0.7, float("inf"))
HEALTHY_ANGLE_RANGE = (-0.2, 0.2)
DELTA_T = 0.008

# Hopper-v3 with exclude_current_positions_from_observation=False (required by
# the module's assert): observation dim = 12, action dim = 3.
OBS_DIM = 12
ACT_DIM = 3

LANE = 128            # TPU lane width: batch tiles are multiples of this
DEFAULT_BLOCK_B = 4096  # rows per grid step; ~small working set, fits all gens


def _round_up(n: int, m: int) -> int:
    return pl.cdiv(n, m) * m


def _reward_kernel(sx_ref, nx_ref, a_ref, out_ref):
    """terminate_when_unhealthy=True path: healthy_reward is a plain constant.

    sx_ref, nx_ref: (1, TB)   x-position of state / next_state (batch on lanes)
    a_ref:          (ACT_DIM, TB) feature-major actions
    out_ref:        (1, TB)   reward
    """
    sx = sx_ref[...].astype(jnp.float32)
    nx = nx_ref[...].astype(jnp.float32)
    a = a_ref[...].astype(jnp.float32)

    # ctrl_cost: explicit per-row squares summed on the VPU (no XLU reduce).
    sq = a[0:1, :] * a[0:1, :]
    for i in range(1, ACT_DIM):
        sq = sq + a[i:i + 1, :] * a[i:i + 1, :]
    ctrl_cost = CTRL_COST_WEIGHT * sq

    forward_reward = FORWARD_REWARD_WEIGHT * ((nx - sx) * (1.0 / DELTA_T))

    reward = forward_reward + HEALTHY_REWARD - ctrl_cost
    out_ref[...] = reward.astype(out_ref.dtype)


def _reward_kernel_health_check(sx_ref, nx_ref, a_ref, ns_ref, out_ref):
    """terminate_when_unhealthy=False path: mask healthy_reward by is_healthy."""
    sx = sx_ref[...].astype(jnp.float32)
    nx = nx_ref[...].astype(jnp.float32)
    a = a_ref[...].astype(jnp.float32)
    ns = ns_ref[...].astype(jnp.float32)        # (OBS_DIM, TB)

    sq = a[0:1, :] * a[0:1, :]
    for i in range(1, ACT_DIM):
        sq = sq + a[i:i + 1, :] * a[i:i + 1, :]
    ctrl_cost = CTRL_COST_WEIGHT * sq

    forward_reward = FORWARD_REWARD_WEIGHT * ((nx - sx) * (1.0 / DELTA_T))

    z = ns[1:2, :]
    angle = ns[2:3, :]
    state_ = ns[2:, :]
    min_s, max_s = HEALTHY_STATE_RANGE
    min_z, max_z = HEALTHY_Z_RANGE
    min_a, max_a = HEALTHY_ANGLE_RANGE
    healthy_state = jnp.all((min_s < state_) & (state_ < max_s),
                            axis=0, keepdims=True)
    healthy_z = (min_z < z) & (z < max_z)
    healthy_angle = (min_a < angle) & (angle < max_a)
    is_healthy = healthy_state & healthy_z & healthy_angle
    healthy_reward = jnp.where(is_healthy, HEALTHY_REWARD, 0.0)

    reward = forward_reward + healthy_reward - ctrl_cost
    out_ref[...] = reward.astype(out_ref.dtype)


@functools.partial(jax.jit, static_argnames=("block_b",))
def _hopper_reward_pallas(state, action, next_state, *, block_b=DEFAULT_BLOCK_B):
    """state, next_state: (B, OBS_DIM); action: (B, ACT_DIM) -> reward (B,)."""
    B = state.shape[0]
    out_dtype = state.dtype

    # Lane-dense, feature-major layout; pad batch to a tile multiple.
    tb = min(block_b, _round_up(B, LANE))
    b_pad = _round_up(B, tb)
    pad = b_pad - B

    sx = jnp.pad(state[:, 0], (0, pad)).reshape(1, b_pad)
    nx = jnp.pad(next_state[:, 0], (0, pad)).reshape(1, b_pad)
    a_t = jnp.pad(action.T, ((0, 0), (0, pad)))                 # (ACT_DIM, b_pad)

    grid = (b_pad // tb,)
    common_in_specs = [
        pl.BlockSpec((1, tb), lambda i: (0, i)),
        pl.BlockSpec((1, tb), lambda i: (0, i)),
        pl.BlockSpec((ACT_DIM, tb), lambda i: (0, i)),
    ]
    out_spec = pl.BlockSpec((1, tb), lambda i: (0, i))
    cparams = pltpu.CompilerParams(dimension_semantics=("parallel",))

    if TERMINATE_WHEN_UNHEALTHY:
        out = pl.pallas_call(
            _reward_kernel,
            out_shape=jax.ShapeDtypeStruct((1, b_pad), out_dtype),
            grid=grid,
            in_specs=common_in_specs,
            out_specs=out_spec,
            compiler_params=cparams,
        )(sx, nx, a_t)
    else:
        ns_t = jnp.pad(next_state.T, ((0, 0), (0, pad)))        # (OBS_DIM, b_pad)
        out = pl.pallas_call(
            _reward_kernel_health_check,
            out_shape=jax.ShapeDtypeStruct((1, b_pad), out_dtype),
            grid=grid,
            in_specs=common_in_specs
            + [pl.BlockSpec((OBS_DIM, tb), lambda i: (0, i))],
            out_specs=out_spec,
            compiler_params=cparams,
        )(sx, nx, a_t, ns_t)

    return out[0, :B]


def hopper_reward(state, action, next_state, *, block_b=DEFAULT_BLOCK_B,
                  force_pallas=False, small_batch_threshold=1024):
    """HopperReward.forward. Dispatches tiny batches to fused XLA (kernel launch
    overhead dominates there); large batches use the tiled Pallas kernel."""
    B = state.shape[0]
    if force_pallas or B >= small_batch_threshold:
        return _hopper_reward_pallas(state, action, next_state, block_b=block_b)
    return _reference(state, action, next_state)


def _reference(state, action, next_state):
    state32 = state.astype(jnp.float32)
    action32 = action.astype(jnp.float32)
    next32 = next_state.astype(jnp.float32)
    ctrl_cost = CTRL_COST_WEIGHT * jnp.sum(jnp.square(action32), axis=-1)
    x_velocity = (next32[..., 0] - state32[..., 0]) / DELTA_T
    forward_reward = FORWARD_REWARD_WEIGHT * x_velocity
    healthy_reward = jnp.full_like(ctrl_cost, HEALTHY_REWARD)
    if not TERMINATE_WHEN_UNHEALTHY:
        z, angle, state_ = next32[..., 1], next32[..., 2], next32[..., 2:]
        min_s, max_s = HEALTHY_STATE_RANGE
        min_z, max_z = HEALTHY_Z_RANGE
        min_a, max_a = HEALTHY_ANGLE_RANGE
        is_healthy = (jnp.all((min_s < state_) & (state_ < max_s), axis=-1)
                      & ((min_z < z) & (z < max_z))
                      & ((min_a < angle) & (angle < max_a)))
        healthy_reward = jnp.where(is_healthy, healthy_reward,
                                   jnp.zeros_like(healthy_reward))
    return (forward_reward + healthy_reward - ctrl_cost).astype(state.dtype)


if __name__ == "__main__":
    key = jax.random.PRNGKey(0)

    # Case 1: small batch (B=8), single padded tile of 128 lanes.
    k1, k2, k3, key = jax.random.split(key, 4)
    B = 8
    state = jax.random.normal(k1, (B, OBS_DIM), dtype=jnp.float32)
    action = jax.random.normal(k2, (B, ACT_DIM), dtype=jnp.float32)
    next_state = jax.random.normal(k3, (B, OBS_DIM), dtype=jnp.float32)

    reward = hopper_reward(state, action, next_state, force_pallas=True)
    jax.block_until_ready(reward)
    ref = _reference(state, action, next_state)
    assert reward.shape == (B,)
    assert jnp.allclose(reward, ref, rtol=1e-5, atol=1e-5), (reward, ref)

    # Case 2: non-multiple-of-tile batch with a multi-step grid (B=300, TB=128).
    k1, k2, k3, key = jax.random.split(key, 4)
    B2 = 300
    state2 = jax.random.normal(k1, (B2, OBS_DIM), dtype=jnp.float32)
    action2 = jax.random.normal(k2, (B2, ACT_DIM), dtype=jnp.float32)
    next_state2 = jax.random.normal(k3, (B2, OBS_DIM), dtype=jnp.float32)

    reward2 = hopper_reward(state2, action2, next_state2,
                            block_b=128, force_pallas=True)
    jax.block_until_ready(reward2)
    ref2 = _reference(state2, action2, next_state2)
    assert reward2.shape == (B2,)
    assert jnp.allclose(reward2, ref2, rtol=1e-5, atol=1e-5), (reward2, ref2)

    print("KERNEL_OK")
</pallas_src>

<mosaic_0001>
module attributes {stable_mosaic.version = 11 : i64} {
  func.func @_reward_kernel(%arg0: i32, %arg1: memref<1x128xf32, #tpu.memory_space<vmem>>, %arg2: memref<1x128xf32, #tpu.memory_space<vmem>>, %arg3: memref<3x128xf32, #tpu.memory_space<vmem>>, %arg4: memref<1x128xf32, #tpu.memory_space<vmem>>) attributes {dimension_semantics = [#tpu.dimension_semantics<parallel>], iteration_bounds = array<i64: 1>, scalar_prefetch = 0 : i64, scratch_operands = 0 : i64, tpu.core_type = #tpu.core_type<tc>, window_params = [{transform_indices = @transform_0, window_bounds = array<i64: 1, 128>}, {transform_indices = @transform_1, window_bounds = array<i64: 1, 128>}, {transform_indices = @transform_2, window_bounds = array<i64: 3, 128>}, {transform_indices = @transform_3, window_bounds = array<i64: 1, 128>}]} {
    %c0 = arith.constant 0 : index
    %c0_0 = arith.constant 0 : index
    %0 = vector.load %arg1[%c0, %c0_0] : memref<1x128xf32, #tpu.memory_space<vmem>>, vector<1x128xf32>
    %c0_1 = arith.constant 0 : index
    %c0_2 = arith.constant 0 : index
    %1 = vector.load %arg2[%c0_1, %c0_2] : memref<1x128xf32, #tpu.memory_space<vmem>>, vector<1x128xf32>
    %c0_3 = arith.constant 0 : index
    %c0_4 = arith.constant 0 : index
    %2 = vector.load %arg3[%c0_3, %c0_4] : memref<3x128xf32, #tpu.memory_space<vmem>>, vector<3x128xf32>
    %3 = vector.extract_strided_slice %2 {offsets = [0, 0], sizes = [1, 128], strides = [1, 1]} : vector<3x128xf32> to vector<1x128xf32>
    %4 = vector.extract_strided_slice %2 {offsets = [0, 0], sizes = [1, 128], strides = [1, 1]} : vector<3x128xf32> to vector<1x128xf32>
    %5 = arith.mulf %3, %4 : vector<1x128xf32>
    %6 = vector.extract_strided_slice %2 {offsets = [1, 0], sizes = [1, 128], strides = [1, 1]} : vector<3x128xf32> to vector<1x128xf32>
    %7 = vector.extract_strided_slice %2 {offsets = [1, 0], sizes = [1, 128], strides = [1, 1]} : vector<3x128xf32> to vector<1x128xf32>
    %8 = arith.mulf %6, %7 : vector<1x128xf32>
    %9 = arith.addf %5, %8 : vector<1x128xf32>
    %10 = vector.extract_strided_slice %2 {offsets = [2, 0], sizes = [1, 128], strides = [1, 1]} : vector<3x128xf32> to vector<1x128xf32>
    %11 = vector.extract_strided_slice %2 {offsets = [2, 0], sizes = [1, 128], strides = [1, 1]} : vector<3x128xf32> to vector<1x128xf32>
    %12 = arith.mulf %10, %11 : vector<1x128xf32>
    %13 = arith.addf %9, %12 : vector<1x128xf32>
    %cst = arith.constant 1.000000e-03 : f32
    %14 = vector.broadcast %cst : f32 to vector<1x128xf32>
    %15 = arith.mulf %14, %13 : vector<1x128xf32>
    %16 = arith.subf %1, %0 : vector<1x128xf32>
    %cst_5 = arith.constant 1.250000e+02 : f32
    %17 = vector.broadcast %cst_5 : f32 to vector<1x128xf32>
    %18 = arith.mulf %16, %17 : vector<1x128xf32>
    %cst_6 = arith.constant 1.000000e+00 : f32
    %19 = vector.broadcast %cst_6 : f32 to vector<1x128xf32>
    %20 = arith.mulf %19, %18 : vector<1x128xf32>
    %cst_7 = arith.constant 1.000000e+00 : f32
    %21 = vector.broadcast %cst_7 : f32 to vector<1x128xf32>
    %22 = arith.addf %20, %21 : vector<1x128xf32>
    %23 = arith.subf %22, %15 : vector<1x128xf32>
    %c0_8 = arith.constant 0 : index
    %c0_9 = arith.constant 0 : index
    %24 = vector.load %arg4[%c0_8, %c0_9] : memref<1x128xf32, #tpu.memory_space<vmem>>, vector<1x128xf32>
    tpu.vector_store %arg4[%c0_8, %c0_9], %23 {strides = array<i32>} : memref<1x128xf32, #tpu.memory_space<vmem>>, vector<1x128xf32>,
    return
  }
  func.func @transform_0(%arg0: i32) -> (i32, i32) {
    %c0_i32 = arith.constant 0 : i32
    %c0_i32_0 = arith.constant 0 : i32
    return %c0_i32, %arg0 : i32, i32
  }
  func.func @transform_1(%arg0: i32) -> (i32, i32) {
    %c0_i32 = arith.constant 0 : i32
    %c0_i32_0 = arith.constant 0 : i32
    return %c0_i32, %arg0 : i32, i32
  }
  func.func @transform_2(%arg0: i32) -> (i32, i32) {
    %c0_i32 = arith.constant 0 : i32
    %c0_i32_0 = arith.constant 0 : i32
    return %c0_i32, %arg0 : i32, i32
  }
  func.func @transform_3(%arg0: i32) -> (i32, i32) {
    %c0_i32 = arith.constant 0 : i32
    %c0_i32_0 = arith.constant 0 : i32
    return %c0_i32, %arg0 : i32, i32
  }
}

</mosaic_0001>

<bundles_post_ra>
// kernel: _hopper_reward_pallas.1
= control target key start
LH: loop header
LB: loop body
LE: loop exit
PB: predicated region body
PF: predicated region fallthrough
CT: control target
= control target key end

     0   :  { %s67_s0 = inlined_call_operand.vmem [shape: f32[1,128], index: 0, kind: input, shape index: {}]   ;;  %s68_s1 = inlined_call_operand.vmem [shape: f32[1,128], index: 1, kind: input, shape index: {}]   ;;  %s69_s2 = inlined_call_operand.vmem [shape: f32[3,128], index: 2, kind: input, shape index: {}]   ;;  %s70_s3 = inlined_call_operand.vmem [shape: f32[1,128], index: 3, kind: output, shape index: {}]  }
   0x1   :  { %v14_v0 = vld [vmem:[%s67_s0] sm:$0x1] }
   0x2   :  { %v15_v1 = vld [vmem:[%s68_s1] sm:$0x1] }
   0x3   :  { %v16_v2 = vld [vmem:[%s69_s2] sm:$0x7]  ;;  %v26_v4 = vsub.f32 %v15_v1, %v14_v0 }
   0x4   :  { %v17_v3 = vmul.f32 %v16_v2, %v16_v2 }
   0x5   :  { %v27_v7 = vmul.f32 125.0, %v26_v4 }
   0x6   :  { %v19_v5 = vrot.slane %v17_v3, 1  ;;  %v22_v6 = vrot.slane %v17_v3, 2 }
   0x7   :  { %v28_v10 = vadd.f32 1.0, %v27_v7 }
   0x8   :  { %v21_v8 = vadd.f32 %v19_v5, %v17_v3 }
   0xa   :  { %v24_v9 = vadd.f32 %v22_v6, %v21_v8 }
   0xc   :  { %v25_v11 = vmul.f32 0.001, %v24_v9 }
   0xe   :  { %v29_v12 = vsub.f32 %v28_v10, %v25_v11 }
  0x10   :  { %30 = vst [vmem:[%s70_s3] sm:$0x1] %v29_v12 }

</bundles_post_ra>
